<compile_context>
chip_gen: v7x
topology: tpu7x:2x2x1
jax: 0.10.0
libtpu: 0.0.40
codegen_flags: <defaults>
</compile_context>

<pallas_src>
import functools

import jax
import jax.numpy as jnp
from jax import lax
from jax.experimental import pallas as pl
from jax.experimental.pallas import tpu as pltpu

BN_EPS = 1e-5


# --------------------------------------------------------------------------
# Pass 1: per-batch partial Gram matrix G = x x^T and pixel sum sx
#         (BN batch stats are finalized from these in the wrapper, O(Cout*Cin^2))
# --------------------------------------------------------------------------
def _stats_kernel(x_ref, g_ref, sx_ref):
    # x_ref:  (1, Cin, TP1)   flat pixel tile of one batch element
    # g_ref:  (1, Cin, Cin)   per-batch resident accumulator (sum of x x^T)
    # sx_ref: (1, Cin, 1)     per-batch resident accumulator (sum of x)
    @pl.when(pl.program_id(1) == 0)
    def _init():
        g_ref[...] = jnp.zeros_like(g_ref)
        sx_ref[...] = jnp.zeros_like(sx_ref)

    x = x_ref[0].astype(jnp.float32)                       # (Cin, TP1)
    gram = lax.dot_general(x, x, (((1,), (1,)), ((), ())),
                           preferred_element_type=jnp.float32,
                           precision=lax.Precision.HIGHEST)  # (Cin, Cin)
    g_ref[0] = g_ref[0] + gram
    sx_ref[0] = sx_ref[0] + jnp.sum(x, axis=1, keepdims=True)


# --------------------------------------------------------------------------
# Pass 2: folded conv+BN -> ReLU -> 2x nearest upsample (copy-based rows,
#         tiny (W,2W) 0/1 matrix for columns) -> lane-contiguous stores
# --------------------------------------------------------------------------
def _apply_kernel(x_ref, w_ref, shift_ref, e_ref, o_ref, *, n_rows):
    # x_ref:     (1, Cin, TH, W)        original-resolution rows
    # w_ref:     (Cout, Cin)            BN-folded conv weight (scale * W)
    # shift_ref: (Cout, 1)              BN-folded bias/shift
    # e_ref:     (W, 2W)                column-duplication 0/1 matrix
    # o_ref:     (1, Cout, 2*TH, 2W)    upsampled output rows
    w = w_ref[...]
    shift = shift_ref[...]
    e = e_ref[...]
    for h in range(n_rows):                               # static unrolled loop
        xr = x_ref[0, :, h, :].astype(jnp.float32)        # (Cin, W)
        zr = jnp.dot(w, xr, preferred_element_type=jnp.float32,
                     precision=lax.Precision.HIGHEST)     # (Cout, W)
        zr = jnp.maximum(zr + shift, 0.0)                 # BN + ReLU (folded)
        row = jnp.dot(zr, e, preferred_element_type=jnp.float32,
                      precision=lax.Precision.HIGHEST)    # (Cout, 2W), exact dup
        row = row.astype(o_ref.dtype)
        o_ref[0, :, 2 * h, :] = row                       # row duplication =
        o_ref[0, :, 2 * h + 1, :] = row                   # two plain stores


# --------------------------------------------------------------------------
# Tile-size helpers (budget-driven, BlockSpec-legal shapes only)
# --------------------------------------------------------------------------
def _pick_stats_tile(P, Cin, x_bytes, budget_bytes=8 << 20, max_lanes=16384):
    cands = [t for t in range(1, P + 1)
             if P % t == 0 and (t % 128 == 0 or t == P)]
    ok = [t for t in cands
          if t <= max_lanes and 2 * Cin * t * x_bytes <= budget_bytes]
    return max(ok) if ok else min(cands)


def _pick_rows_per_tile(H, W, Cin, Cout, x_bytes,
                        budget_bytes=8 << 20, max_unroll=64):
    cands = [t for t in range(1, H + 1)
             if H % t == 0 and (t % 8 == 0 or t == H)]

    def step_bytes(t):  # double-buffered input + output blocks (f32 out)
        return 2 * (Cin * t * W * x_bytes + Cout * t * 4 * W * 4)

    ok = [t for t in cands if t <= max_unroll and step_bytes(t) <= budget_bytes]
    return max(ok) if ok else min(cands)


def _col_dup_matrix(W):
    """(W, 2W) 0/1 matrix: out[:, 2c] = out[:, 2c+1] = in[:, c]."""
    v = jnp.arange(2 * W)
    return (jnp.arange(W)[:, None] == (v // 2)[None, :]).astype(jnp.float32)


# --------------------------------------------------------------------------
# Wrapper
# --------------------------------------------------------------------------
def upconv_block(x_nchw, conv_w, conv_b, bn_gamma, bn_beta, *,
                 x_dtype=jnp.float32):
    """x_nchw: (N, Cin, H, W); conv_w: (Cout, Cin, 1, 1); conv_b/bn_*: (Cout,).

    x_dtype=jnp.bfloat16 streams the input in bf16 (f32 accumulation & stats)
    to halve the HBM read of x; output is always f32.
    """
    N, Cin, H, W = x_nchw.shape
    Cout = conv_w.shape[0]
    P = H * W
    x_bytes = jnp.dtype(x_dtype).itemsize

    xk = x_nchw.astype(x_dtype)            # streamed input (optionally bf16)
    x3 = xk.reshape(N, Cin, P)             # free reshape for the stats pass
    w_mat = conv_w.reshape(Cout, Cin).astype(jnp.float32)
    b_col = conv_b.reshape(Cout, 1).astype(jnp.float32)
    gamma = bn_gamma.reshape(Cout, 1).astype(jnp.float32)
    beta = bn_beta.reshape(Cout, 1).astype(jnp.float32)

    # ---- Pass 1: per-batch partial Gram/sum accumulators -------------------
    TP1 = _pick_stats_tile(P, Cin, x_bytes)
    stats_flops = int(2 * N * Cin * Cin * P + N * Cin * P)
    stats_bytes = int(N * Cin * P * x_bytes + N * (Cin * Cin + Cin) * 4)

    g_parts, sx_parts = pl.pallas_call(
        _stats_kernel,
        out_shape=(jax.ShapeDtypeStruct((N, Cin, Cin), jnp.float32),
                   jax.ShapeDtypeStruct((N, Cin, 1), jnp.float32)),
        grid=(N, P // TP1),
        in_specs=[pl.BlockSpec((1, Cin, TP1), lambda n, j: (n, 0, j))],
        out_specs=(pl.BlockSpec((1, Cin, Cin), lambda n, j: (n, 0, 0)),
                   pl.BlockSpec((1, Cin, 1), lambda n, j: (n, 0, 0))),
        compiler_params=pltpu.CompilerParams(
            dimension_semantics=("parallel", "arbitrary"),
            vmem_limit_bytes=32 * 1024 * 1024),
        cost_estimate=pl.CostEstimate(flops=stats_flops, transcendentals=0,
                                      bytes_accessed=stats_bytes),
    )(x3)

    # ---- Finalize BN batch stats once (tiny XLA op) and fold into conv -----
    # Every pixel is replicated exactly 4x by the nearest upsample, so stats
    # over the upsampled conv output equal stats over the original pixels.
    gram = jnp.sum(g_parts, axis=0)                        # (Cin, Cin)
    sx = jnp.sum(sx_parts, axis=0)                         # (Cin, 1)
    npix = float(N * P)
    mx = sx / npix
    # NOTE: uncentered second moment; f32 accumulation is adequate here, use
    # compensated/centered per-tile sums if channel means become very large.
    cov = gram / npix - mx @ mx.T                          # (Cin, Cin)
    mean_y = w_mat @ mx + b_col                            # (Cout, 1)
    var_y = jnp.maximum(
        jnp.sum((w_mat @ cov) * w_mat, axis=1, keepdims=True), 0.0)
    rstd = lax.rsqrt(var_y + BN_EPS)
    scale = gamma * rstd
    shift = (b_col - mean_y) * scale + beta                # (Cout, 1)
    w_eff = scale * w_mat                                  # (Cout, Cin)

    # ---- Pass 2: conv+BN+ReLU + fused 2x upsample, fully parallel grid -----
    TH = _pick_rows_per_tile(H, W, Cin, Cout, x_bytes)
    e_mat = _col_dup_matrix(W)                             # tiny (W, 2W) const

    apply_flops = int(2 * N * P * Cin * Cout      # folded conv
                      + 4 * N * Cout * P * W      # column duplication
                      + 2 * N * Cout * P)         # shift + relu
    apply_bytes = int(N * Cin * P * x_bytes + N * Cout * 4 * P * 4
                      + (Cout * Cin + Cout + 2 * W * W) * 4)

    out = pl.pallas_call(
        functools.partial(_apply_kernel, n_rows=TH),
        out_shape=jax.ShapeDtypeStruct((N, Cout, 2 * H, 2 * W), jnp.float32),
        grid=(N, H // TH),
        in_specs=[pl.BlockSpec((1, Cin, TH, W), lambda n, j: (n, 0, j, 0)),
                  pl.BlockSpec((Cout, Cin), lambda n, j: (0, 0)),
                  pl.BlockSpec((Cout, 1), lambda n, j: (0, 0)),
                  pl.BlockSpec((W, 2 * W), lambda n, j: (0, 0))],
        out_specs=pl.BlockSpec((1, Cout, 2 * TH, 2 * W),
                               lambda n, j: (n, 0, j, 0)),
        compiler_params=pltpu.CompilerParams(
            dimension_semantics=("parallel", "parallel"),
            vmem_limit_bytes=32 * 1024 * 1024),
        cost_estimate=pl.CostEstimate(flops=apply_flops, transcendentals=0,
                                      bytes_accessed=apply_bytes),
    )(xk, w_eff, shift, e_mat)

    return out


# --------------------------------------------------------------------------
# Pure-JAX reference matching the PyTorch training-mode forward.
# --------------------------------------------------------------------------
def reference(x_nchw, conv_w, conv_b, bn_gamma, bn_beta):
    x_up = jnp.repeat(jnp.repeat(x_nchw, 2, axis=2), 2, axis=3)
    y = jnp.einsum('nchw,oc->nohw', x_up, conv_w.reshape(conv_w.shape[0], -1),
                   precision=lax.Precision.HIGHEST)
    y = y + conv_b[None, :, None, None]
    mean = jnp.mean(y, axis=(0, 2, 3), keepdims=True)
    var = jnp.mean((y - mean) ** 2, axis=(0, 2, 3), keepdims=True)
    y = (y - mean) / jnp.sqrt(var + BN_EPS)
    y = y * bn_gamma[None, :, None, None] + bn_beta[None, :, None, None]
    return jnp.maximum(y, 0.0)


if __name__ == "__main__":
    key = jax.random.PRNGKey(0)
    k_x, k_w, k_b, k_g, k_be = jax.random.split(key, 5)

    N, Cin, H, W = 2, 4, 16, 16
    Cout = 8

    x = jax.random.normal(k_x, (N, Cin, H, W), dtype=jnp.float32)
    conv_w = jax.random.normal(k_w, (Cout, Cin, 1, 1), dtype=jnp.float32) * 0.1
    conv_b = jax.random.normal(k_b, (Cout,), dtype=jnp.float32) * 0.1
    bn_gamma = 1.0 + 0.1 * jax.random.normal(k_g, (Cout,), dtype=jnp.float32)
    bn_beta = 0.1 * jax.random.normal(k_be, (Cout,), dtype=jnp.float32)

    ref = reference(x, conv_w, conv_b, bn_gamma, bn_beta)

    # f32 path: must match the PyTorch training-mode forward tightly.
    out = upconv_block(x, conv_w, conv_b, bn_gamma, bn_beta)
    out = jax.block_until_ready(out)
    assert out.shape == (N, Cout, 2 * H, 2 * W), out.shape
    err = float(jnp.max(jnp.abs(out - ref)))
    assert jnp.allclose(out, ref, atol=1e-3, rtol=1e-3), err

    # bf16-streaming path (halves HBM read of x, f32 accumulation/stats).
    out_bf16 = upconv_block(x, conv_w, conv_b, bn_gamma, bn_beta,
                            x_dtype=jnp.bfloat16)
    out_bf16 = jax.block_until_ready(out_bf16)
    err_bf16 = float(jnp.max(jnp.abs(out_bf16 - ref)))
    assert jnp.allclose(out_bf16, ref, atol=1e-1, rtol=1e-1), err_bf16

    print("KERNEL_OK")
</pallas_src>

<mosaic_0001>
module attributes {stable_mosaic.version = 11 : i64} {
  func.func @_stats_kernel(%arg0: i32, %arg1: i32, %arg2: memref<1x4x256xf32, #tpu.memory_space<vmem>>, %arg3: memref<1x4x4xf32, #tpu.memory_space<vmem>>, %arg4: memref<1x4x1xf32, #tpu.memory_space<vmem>>) attributes {dimension_semantics = [#tpu.dimension_semantics<parallel>, #tpu.dimension_semantics<arbitrary>], iteration_bounds = array<i64: 2, 1>, scalar_prefetch = 0 : i64, scratch_operands = 0 : i64, tpu.core_type = #tpu.core_type<tc>, window_params = [{transform_indices = @transform_0, window_bounds = array<i64: 1, 4, 256>}, {transform_indices = @transform_1, window_bounds = array<i64: 1, 4, 4>}, {transform_indices = @transform_2, window_bounds = array<i64: 1, 4, 1>}]} {
    %c0_i32 = arith.constant 0 : i32
    %0 = arith.cmpi eq, %arg1, %c0_i32 : i32
    %1 = arith.extui %0 : i1 to i32
    %c0_i32_0 = arith.constant 0 : i32
    %2 = arith.cmpi ne, %1, %c0_i32_0 : i32
    scf.if %2 {
      %cst_16 = arith.constant 0.000000e+00 : f32
      %20 = vector.broadcast %cst_16 : f32 to vector<1x4x4xf32>
      %c0_17 = arith.constant 0 : index
      %c0_18 = arith.constant 0 : index
      %c0_19 = arith.constant 0 : index
      %21 = vector.load %arg3[%c0_17, %c0_18, %c0_19] : memref<1x4x4xf32, #tpu.memory_space<vmem>>, vector<1x4x4xf32>
      tpu.vector_store %arg3[%c0_17, %c0_18, %c0_19], %20 {strides = array<i32>} : memref<1x4x4xf32, #tpu.memory_space<vmem>>, vector<1x4x4xf32>,
      %cst_20 = arith.constant 0.000000e+00 : f32
      %22 = vector.broadcast %cst_20 : f32 to vector<1x4x1xf32>
      %c0_21 = arith.constant 0 : index
      %c0_22 = arith.constant 0 : index
      %c0_23 = arith.constant 0 : index
      %23 = vector.load %arg4[%c0_21, %c0_22, %c0_23] : memref<1x4x1xf32, #tpu.memory_space<vmem>>, vector<1x4x1xf32>
      tpu.vector_store %arg4[%c0_21, %c0_22, %c0_23], %22 {strides = array<i32>} : memref<1x4x1xf32, #tpu.memory_space<vmem>>, vector<1x4x1xf32>,
    } else {
    }
    %c0 = arith.constant 0 : index
    %c0_1 = arith.constant 0 : index
    %c0_2 = arith.constant 0 : index
    %3 = vector.load %arg2[%c0, %c0_1, %c0_2] : memref<1x4x256xf32, #tpu.memory_space<vmem>>, vector<1x4x256xf32>
    %4 = vector.shape_cast %3 : vector<1x4x256xf32> to vector<4x256xf32>
    %cst = arith.constant dense<0.000000e+00> : vector<4x4xf32>
    %5 = tpu.matmul %4, %4, %cst {dimension_numbers = #tpu.dot_dimension_numbers<[1], [1], [0], [0], [0, 0, 1, 0], [], []>, precision = #tpu.contract_precision<fp32>} : vector<4x256xf32>, vector<4x256xf32>, vector<4x4xf32> -> vector<4x4xf32>
    %c0_3 = arith.constant 0 : index
    %c0_4 = arith.constant 0 : index
    %c0_5 = arith.constant 0 : index
    %6 = vector.load %arg3[%c0_3, %c0_4, %c0_5] : memref<1x4x4xf32, #tpu.memory_space<vmem>>, vector<1x4x4xf32>
    %7 = vector.shape_cast %6 : vector<1x4x4xf32> to vector<4x4xf32>
    %8 = arith.addf %7, %5 : vector<4x4xf32>
    %c0_6 = arith.constant 0 : index
    %c0_7 = arith.constant 0 : index
    %c0_8 = arith.constant 0 : index
    %9 = vector.load %arg3[%c0_6, %c0_7, %c0_8] : memref<1x4x4xf32, #tpu.memory_space<vmem>>, vector<1x4x4xf32>
    %10 = vector.shape_cast %9 : vector<1x4x4xf32> to vector<4x4xf32>
    %11 = vector.shape_cast %8 : vector<4x4xf32> to vector<1x4x4xf32>
    tpu.vector_store %arg3[%c0_6, %c0_7, %c0_8], %11 {strides = array<i32>} : memref<1x4x4xf32, #tpu.memory_space<vmem>>, vector<1x4x4xf32>,
    %c0_9 = arith.constant 0 : index
    %c0_10 = arith.constant 0 : index
    %c0_11 = arith.constant 0 : index
    %12 = vector.load %arg4[%c0_9, %c0_10, %c0_11] : memref<1x4x1xf32, #tpu.memory_space<vmem>>, vector<1x4x1xf32>
    %13 = vector.shape_cast %12 : vector<1x4x1xf32> to vector<4x1xf32>
    %cst_12 = arith.constant dense<0.000000e+00> : vector<4xf32>
    %14 = vector.multi_reduction <add>, %4, %cst_12 [1] : vector<4x256xf32> to vector<4xf32>
    %15 = vector.shape_cast %14 : vector<4xf32> to vector<4x1xf32>
    %16 = arith.addf %13, %15 : vector<4x1xf32>
    %c0_13 = arith.constant 0 : index
    %c0_14 = arith.constant 0 : index
    %c0_15 = arith.constant 0 : index
    %17 = vector.load %arg4[%c0_13, %c0_14, %c0_15] : memref<1x4x1xf32, #tpu.memory_space<vmem>>, vector<1x4x1xf32>
    %18 = vector.shape_cast %17 : vector<1x4x1xf32> to vector<4x1xf32>
    %19 = vector.shape_cast %16 : vector<4x1xf32> to vector<1x4x1xf32>
    tpu.vector_store %arg4[%c0_13, %c0_14, %c0_15], %19 {strides = array<i32>} : memref<1x4x1xf32, #tpu.memory_space<vmem>>, vector<1x4x1xf32>,
    return
  }
  func.func @transform_0(%arg0: i32, %arg1: i32) -> (i32, i32, i32) {
    %c0_i32 = arith.constant 0 : i32
    %c0_i32_0 = arith.constant 0 : i32
    return %arg0, %c0_i32, %arg1 : i32, i32, i32
  }
  func.func @transform_1(%arg0: i32, %arg1: i32) -> (i32, i32, i32) {
    %c0_i32 = arith.constant 0 : i32
    %c0_i32_0 = arith.constant 0 : i32
    %c0_i32_1 = arith.constant 0 : i32
    return %arg0, %c0_i32, %c0_i32_0 : i32, i32, i32
  }
  func.func @transform_2(%arg0: i32, %arg1: i32) -> (i32, i32, i32) {
    %c0_i32 = arith.constant 0 : i32
    %c0_i32_0 = arith.constant 0 : i32
    %c0_i32_1 = arith.constant 0 : i32
    return %arg0, %c0_i32, %c0_i32_0 : i32, i32, i32
  }
}

</mosaic_0001>

<bundles_post_ra>
// kernel: tpu_custom_call.1
= control target key start
LH: loop header
LB: loop body
LE: loop exit
PB: predicated region body
PF: predicated region fallthrough
CT: control target
= control target key end

     0   :  { %8 = vsyncpa [#allocation3], 0  ;;  %s1210_s0 = inlined_call_operand.hbm [shape: f32[2,4,256], index: 0, kind: input, shape index: {}]   ;;  %s1211_s1 = inlined_call_operand.hbm [shape: f32[2,4,4], index: 1, kind: output, shape index: {0}]   ;;  %s1212_s2 = inlined_call_operand.vmem [shape: f32[2,4,1], index: 2, kind: output, shape index: {1}]  }
   0x1   :  { %10 = vsyncpa [#allocation3 + $0x1], 0 }
   0x2   :  { %11 = vsyncpa [#allocation4], 0 }
   0x3   :  { %13 = vsyncpa [#allocation4 + $0x1], 0  ;;  %s1024_s9 = smov 0   ;;  %s1026_s10 = smov 0  }
   0x4   :  { %s1028_s11 = smov 0   ;;  %s1030_s12 = smov 0  }
   0x5   :  { %s1032_s13 = smov 0   ;;  %s1034_s14 = smov 0  }
   0x6 LB: > { %s812_s15 = sadd.s32 4294967295, %s1004_s14   ;;  %s813_s16 = sadd.s32 4294967294, %s1004_s14   ;;  %s1004_s14 = sphi %s1034_s14, %s19_s14   ;;  %s1000_s13 = sphi %s1032_s13, %s1228_s13   ;;  %s996_s12 = sphi %s1030_s12, %s1227_s12   ;;  %s992_s11 = sphi %s1028_s11, %s1226_s11   ;;  %s988_s10 = sphi %s1026_s10, %s1225_s10   ;;  %s984_s9 = sphi %s1024_s9, %s1224_s9  }
   0x7   : > { %s31_s17 = sadd.s32 1, %s1000_s13  ;;  %s40_s18 = sadd.s32 1, %s992_s11 }
   0x8   : > { %p33_p0 = scmp.ge.s32.totalorder %s31_s17, 2  ;;  %p47_p1 = scmp.ne.s32.totalorder %s992_s11, %s988_s10 }
   0x9   : > { %p48_p2 = scmp.eq.s32.totalorder %s1004_s14, 0  ;;  %p53_p3 = scmp.ne.s32.totalorder %s988_s10, %s984_s9 }
   0xa   : > { %s1230_s17 = smov (%p33_p0, %s31_s17), 0  ;;  %p54_p5 = scmp.eq.s32.totalorder %s812_s15, 0 }
   0xb   : > { %p1065_p4 = por %p48_p2, %p47_p1  ;;  %s35_s20 = ssub.s32 %s1000_s13, %s1230_s17 }
   0xc   : > { %p77_p6 = scmp.eq.s32.totalorder %s812_s15, 1  ;;  %p38_p7 = scmp.eq.s32.totalorder %s35_s20, 0 }
   0xd   : > { %p1071_p8 = por %p54_p5, %p53_p3  ;;  %p83_p10 = scmp.eq.s32.totalorder %s813_s16, 1 }
   0xe   : > { %p1075_p9 = por %p77_p6, %p47_p1  ;;  %p840_p13 = scmp.lt.s32.totalorder %s1004_s14, 2 }
   0xf   : > { %s1080_s23 = scalar_select %p38_p7, %s992_s11, %s40_s18  }
  0x10   : > { %s1216_s22 = scalar_select %p1075_p9, 1, 0 }
  0x11   : > { %p1082_p11 = por %p83_p10, %p53_p3  ;;  %s129_s25 = sand.u32 1, %s992_s11  }
  0x12   : > { %s816_s26 = sshll.u32 %s129_s25, 3  ;;  %s827_s27 = sshll.u32 %s1000_s13, 7 }
  0x13   : > { %s1217_s24 = scalar_select %p1082_p11, 1, 0 }
  0x14   : > { %s1093_s30 = scalar_lea.hbm %s1210_s0, %s827_s27  ;;  %s133_s3 = scalar_lea.vmem [#allocation2], %s816_s26 }
  0x15   : > { %s143_s4 = sshll.u32 %s133_s3, 4  ;;  %p1099_p0 = pnand %p840_p13, %p1065_p4  ;;  %s1095_s4 = int_to_ptr.vmem [resolvable:$true] %s143_s4 }
  0x16   : > { %s130_s6 = scalar_lea.sflag [#allocation3], %s129_s25  ;;  %s892_s7 = scalar_lea.hbm %s1093_s30, 128 }
  0x17   : > { %p893_p3 = scmp.ne.s32.totalorder %s1093_s30, %s892_s7  ;;  %p894_p5 = pneg %p1099_p0 }
  0x18   : > { %s897_s16 = scalar_lea.hbm %s1210_s0, 256  ;;  %p898_p4 = scmp.lt.u32.totalorder %s1093_s30, %s1210_s0 }
  0x19   : > { %p895_p6 = pnand %p894_p5, %p893_p3  ;;  %p899_p10 = scmp.lt.u32.totalorder %s897_s16, %s892_s7 }
  0x1a   : > { %p901_p12 = scmp.lt.u32.totalorder %s892_s7, %s1093_s30 }
  0x1b   : > { %p896_p7 = pneg %p895_p6  ;;  %p900_p13 = por %p899_p10, %p898_p4 }
  0x1d   : > { %p902_p1 = por %p901_p12, %p900_p13 }
  0x1f   : > { %p903_p2 = pnand %p902_p1, %p896_p7 }
  0x21   : > { %906 = shalt.err (!%p903_p2)
}
  0x22   : > { %s907_s20 = scalar_lea.vmem %s1095_s4, 128  ;;  %s1006_s25 = smov [#allocation2]  }
  0x23   : > { %p908_p3 = scmp.ne.s32.totalorder %s1095_s4, %s907_s20  ;;  %s912_s26 = sshll.u32 %s1006_s25, 4  ;;  %s913_s26 = int_to_ptr.vmem [resolvable:$false] %s912_s26 }
  0x24   : > { %s914_s27 = scalar_lea.vmem %s913_s26, 256  ;;  %p915_p9 = scmp.lt.s32.totalorder %s1095_s4, %s913_s26 }
  0x25   : > { %p910_p6 = pnand %p908_p3, %p894_p5  ;;  %p916_p4 = scmp.lt.s32.totalorder %s914_s27, %s907_s20 }
  0x27   : > { %p911_p11 = pneg %p910_p6  ;;  %p917_p10 = por %p916_p4, %p915_p9 }
  0x29   : > { %p918_p12 = pnand %p917_p10, %p911_p11 }
  0x2b   : > { %921 = shalt.err (!%p918_p12)
}
  0x2c   : > { %835 = dma.hbm_to_vmem [thread:$0]  (!%p1099_p0), %s1093_s30, 128, %s1095_s4, %s130_s6  }
  0x2d   : > { %p1219_p1 = scmp.lt.s32.totalorder %s1004_s14, 3  ;;  %p1220_p2 = scmp.ge.s32.totalorder %s1004_s14, 1 }
  0x2f   : > { %p149_p5 = pnand %p1220_p2, %p1219_p1 }
  0x30   : > { %s1135_s28 = sand.u32 (!%p149_p5), 1, %s988_s10  }
  0x31   : > { %152 = sbr.rel (%p149_p5) target bundleno = 312 (0x138), region = 24  ;;  %s820_s29 = sshll.u32 (!%p149_p5), %s1135_s28, 3 }
  0x32   : > { %s155_s3 = scalar_lea.sflag (!%p149_p5), [#allocation3], %s1135_s28  ;;  %s158_s7 = scalar_lea.vmem (!%p149_p5), [#allocation2], %s820_s29 }
  0x38   : > { %975 = dma.done.wait (%p1071_p8), %s155_s3, 128  }
  0x39   : > { %977 = vsyncadd (%p1071_p8), %s155_s3, 4294967168  ;;  %vm677_vm0 = vcmask 1043456   ;;  %v196_v0 = vld [vmem:[%s158_s7] sm:$0xff]  ;;  %p184_p8 = scmp.lt.s32.totalorder %s996_s12, 1  ;;  %s821_s30 = sshll.u32 %s1135_s28, 2  ;;  %vm192_vm1 = vcmask 27648  }
  0x3a   : > { %v198_v1 = vcombine.high %v196_v0, %v196_v0  ;;  %v202_v2 = vand.u32 4294901760, %v196_v0  ;;  %v678_v3 = vsel %vm677_vm0, %v196_v0, 0.0  ;;  %s1146_s5 = scalar_lea.vmem [#allocation5], %s821_s30  ;;  %v1007_v15 = vmov 0.0   ;;  %s824_s16 = sshll.u32 %s996_s12, 6 }
  0x3b   : > { %s185_s21 = scalar_select %p184_p8, %s996_s12, 1  ;;  %193 = vst.msk [vmem:[%s1146_s5] sm:$0xf] %vm192_vm1, %v1007_v15  ;;  %vm194_vm2 = vcmask 3072  }
  0x3c   : > { %v200_v4 = vand.u32 4294901760, %v198_v1  ;;  %v273_v5 = vsub.f32 %v196_v0, %v202_v2  ;;  %v679_v6 = vsel %vm677_vm0, %v198_v1, 0.0  ;;  %s704_s18 = sshll.u32 %s1146_s5, 4  ;;  %s1159_s25 = scalar_lea.hbm %s1211_s1, %s824_s16  ;;  %s1161_s18 = int_to_ptr.vmem [resolvable:$true] %s704_s18 }
  0x3d   : > { %v680_v7 = vadd.f32 %v679_v6, %v678_v3  ;;  %s822_s4 = sshll.u32 %s185_s21, 2  ;;  %s687_s26 = scalar_lea.sflag [#allocation4], %s1135_s28 }
  0x3e   : > { %201 = vmatprep.subr.mxu0 %v200_v4  ;;  %v267_v8 = vsub.f32 %v198_v1, %v200_v4  ;;  %v274_v9 = vand.u32 4294901760, %v273_v5  ;;  %357 = vmatprep.mubr.f32.mxu1 %v200_v4  ;;  %s187_s15 = scalar_lea.vmem %s1212_s2, %s822_s4  ;;  %s922_s27 = scalar_lea.vmem %s1161_s18, 64 }
  0x3f   : > { %203 = vmatpush1.xpose.msra.mxu0 %v202_v2  ;;  %681 = vadd.xlane.f32.xlu0 %v680_v7  ;;  %195 = vst.msk [vmem:[%s187_s15] sm:$0xf] %vm194_vm2, %v1007_v15  ;;  %p923_p9 = scmp.ne.s32.totalorder %s1161_s18, %s922_s27  ;;  %p1221_p11 = scmp.ne.s32.totalorder %s1216_s22, 0 }
  0x40   : > { %v268_v10 = vand.u32 4294901760, %v267_v8  ;;  %v275_v11 = vsub.f32 %v273_v5, %v274_v9  ;;  %366 = vmatprep.subr.mxu0 %v267_v8  ;;  %s1008_s12 = smov [#allocation5]  }
  0x41   : > { %p924_p0 = pnand %p923_p9, %p1221_p11  ;;  %s926_s29 = sshll.u32 %s1008_s12, 4  ;;  %s927_s29 = int_to_ptr.vmem [resolvable:$false] %s926_s29 }
  0x42   : > { %v269_v12 = vsub.f32 %v267_v8, %v268_v10  ;;  %v276_v13 = vand.u32 4294901760, %v275_v11  ;;  %v672_v34 = vld [vmem:[%s1146_s5] sm:$0xf]  ;;  %s928_s3 = scalar_lea.vmem %s927_s29, 128  ;;  %p929_p13 = scmp.lt.s32.totalorder %s1161_s18, %s927_s29 }
  0x43   : > { %p925_p7 = pneg %p924_p0  ;;  %p930_p3 = scmp.lt.s32.totalorder %s928_s3, %s922_s27 }
  0x44   : > { %v270_v14 = vand.u32 4294901760, %v269_v12 }
  0x45   : > { %p931_p6 = por %p930_p3, %p929_p13 }
  0x46   : > { %287 = vmatprep.subr.mxu1 %v270_v14  ;;  %271 = vmatprep.mubr.f32.mxu0 %v270_v14  ;;  %v676_v16 = vld [vmem:[%s187_s15] sm:$0xf] }
  0x47   : > { %293 = vmatpush1.xpose.msra.mxu1 %v276_v13  ;;  %277 = vmatmul.mubr.f32.vlgmr.msra.gmra.mrb[0].mxu0 %v276_v13  ;;  %p932_p4 = pnand %p931_p6, %p925_p7 }
  0x48   : > { %369 = vmatpush1.xpose.msra.mxu0 %v273_v5  ;;  %443 = vmatprep.subr.mxu1 %v200_v4 }
  0x49   : > { %434 = vmatprep.mubr.f32.mxu0 %v267_v8  ;;  %523 = vmatprep.subr.mxu0 %v268_v10 }
  0x4a   : > { %359 = vmatmul.mubr.f32.vlgmr.msra.gmra.mrb[0].mxu1 %v202_v2 }
  0x4b   : > { %445 = vmatpush1.xpose.msra.mxu1 %v202_v2  ;;  %437 = vmatmul.mubr.f32.vlgmr.msra.gmra.mrb[2].mxu0 %v273_v5 }
  0x4c   : > { %511 = vmatprep.mubr.f32.mxu1 %v268_v10  ;;  %527 = vmatpush1.xpose.msra.mxu0 %v274_v9 }
  0x4d   : > { %599 = vmatprep.subr.mxu1 %v200_v4  ;;  %591 = vmatprep.mubr.f32.mxu0 %v200_v4 }
  0x4e   : > { %515 = vmatmul.mubr.f32.vlgmr.msra.gmra.mrb[2].mxu1 %v274_v9 }
  0x4f   : > { %601 = vmatpush1.xpose.msra.mxu1 %v202_v2  ;;  %593 = vmatmul.mubr.f32.vlgmr.msra.gmra.mrb[4].mxu0 %v202_v2 }
  0x50   : > { %665 = vmatprep.mubr.f32.mxu1 %v200_v4 }
  0x52   : > { %667 = vmatmul.mubr.f32.vlgmr.msra.gmra.mrb[4].mxu1 %v202_v2 }
  0xcc   : > { %v682_v17 = vpop.xlane.xlu0 %681 }
  0xcd   : > { %v683_v18 = vadd.f32 %v682_v17, %v676_v16 }
  0xcf   : > { %685 = vst.msk [vmem:[%s187_s15] sm:$0xf] %vm194_vm2, %v683_v18 }
 0x11a   : > { %v278_v19 = vpop.f32.mrb[0].mxu0 }
 0x11b   : > { %v280_v20 = vpop.f32.mrb[1].mxu0 }
 0x11d   : > { %v360_v21 = vpop.f32.mrb[0].mxu1 }
 0x11e   : > { %v361_v22 = vadd.f32 %v360_v21, %v278_v19  ;;  %v362_v23 = vpop.f32.mrb[1].mxu1  ;;  %v438_v24 = vpop.f32.mrb[2].mxu0 }
 0x11f   : > { %v440_v25 = vpop.f32.mrb[3].mxu0 }
 0x120   : > { %v439_v26 = vadd.f32 %v438_v24, %v361_v22 }
 0x121   : > { %v516_v27 = vpop.f32.mrb[2].mxu1 }
 0x122   : > { %v517_v28 = vadd.f32 %v516_v27, %v439_v26  ;;  %v518_v29 = vpop.f32.mrb[3].mxu1  ;;  %v594_v30 = vpop.f32.mrb[4].mxu0 }
 0x123   : > { %v596_v31 = vpop.f32.mrb[5].mxu0 }
 0x124   : > { %v595_v32 = vadd.f32 %v594_v30, %v517_v28 }
 0x125   : > { %v668_v33 = vpop.f32.mrb[4].mxu1 }
 0x126   : > { %v669_v35 = vadd.f32 %v668_v33, %v595_v32  ;;  %v670_v36 = vpop.f32.mrb[5].mxu1 }
 0x128   : > { %v673_v37 = vadd.f32 %v672_v34, %v669_v35 }
 0x12a   : > { %675 = vst.msk [vmem:[%s1146_s5] sm:$0xf] %vm192_vm1, %v673_v37 }
 0x12b   : > { %935 = shalt.err (!%p932_p4)
}
 0x12c   : > { %s936_s28 = scalar_lea.hbm %s1159_s25, 64  ;;  %s940_s30 = scalar_lea.hbm %s1211_s1, 128 }
 0x12d   : > { %p937_p10 = scmp.ne.s32.totalorder %s1159_s25, %s936_s28  ;;  %p941_p2 = scmp.lt.u32.totalorder %s1159_s25, %s1211_s1 }
 0x12e   : > { %p942_p5 = scmp.lt.u32.totalorder %s940_s30, %s936_s28  ;;  %p944_p9 = scmp.lt.u32.totalorder %s936_s28, %s1159_s25 }
 0x12f   : > { %p938_p12 = pnand %p937_p10, %p1221_p11 }
 0x130   : > { %p943_p8 = por %p942_p5, %p941_p2 }
 0x131   : > { %p939_p1 = pneg %p938_p12 }
 0x132   : > { %p945_p0 = por %p944_p9, %p943_p8 }
 0x134   : > { %p946_p7 = pnand %p945_p0, %p939_p1 }
 0x136   : > { %949 = shalt.err (!%p946_p7)
}
 0x137   : > { %830 = dma.vmem_to_hbm [thread:$0]  (%p1221_p11), %s1161_s18, 64, %s1159_s25, %s687_s26  }
 0x138 PF: > { %s719_s6 = sand.u32 1, %s984_s9   ;;  %p1222_p13 = scmp.ne.s32.totalorder %s1217_s24, 0 }
 0x139   : > { %p1223_p3 = scmp.ge.s32.totalorder %s1004_s14, 2  ;;  %s720_s8 = scalar_lea.sflag [#allocation4], %s719_s6 }
 0x13b   : > { %p837_p6 = pnand %p1223_p3, %p1222_p13 }
 0x13d   : > { %979 = dma.done.wait (!%p837_p6), %s720_s8, 64  }
 0x13e   : > { %981 = vsyncadd (!%p837_p6), %s720_s8, 4294967232  ;;  %s19_s14 = sadd.s32 1, %s1004_s14   ;;  %s1224_s9 = smov %s988_s10 }
 0x13f   : > { %p16_p4 = scmp.ge.s32.totalorder %s19_s14, 4   ;;  %s1225_s10 = smov %s992_s11 }
 0x140   : > { %s1226_s11 = smov %s1080_s23  ;;  %s1227_s12 = smov %s1000_s13 }
 0x141   : > { %s1228_s13 = smov %s1230_s17  ;;  %18 = sbr.rel (!%p16_p4) target bundleno = 6 (0x6), region = 85 }
 0x148   :  { %732 = vsyncpa [#allocation3], 1 }
 0x149   :  { %734 = vsyncpa [#allocation3 + $0x1], 1 }
 0x14a   :  { %735 = vsyncpa [#allocation4], 1 }
 0x14b   :  { %737 = vsyncpa [#allocation4 + $0x1], 1 }

</bundles_post_ra>
